<compile_context>
chip_gen: v7x
topology: tpu7x:2x2x1
jax: 0.10.0
libtpu: 0.0.40
codegen_flags: <defaults>
</compile_context>

<pallas_src>
import functools

import jax
import jax.numpy as jnp
from jax.experimental import pallas as pl
from jax.experimental.pallas import tpu as pltpu


def stance_kernel(body_ref, hl_ref, wred_ref, wout_ref, ball_ref, out_ref,
                  *, n_sents):
    """TB (headline, body) pairs per grid step.

    body_ref : (TB, N*S, E) f32   token embeddings of each document (flattened)
    hl_ref   : (TB, S, E)   f32   token embeddings of each headline
    wred_ref : (E, 128)     f32   reducer weight with 1/S pre-folded
    wout_ref : (256, 4)     f32   [wb @ wo[:32] ; wh @ wo[32:]]
    ball_ref : (2, 128)     f32   row 0 = reducer bias, row 1[:4] = fused out bias
    out_ref  : (TB, 4)      f32   log-softmax logits
    """
    tb = body_ref.shape[0]

    # ---- reducer pooling (token mean folded into wred; sentence mean here) ----
    body_sum = jnp.sum(body_ref[...], axis=1) * (1.0 / n_sents)   # (TB, E)
    hl_sum = jnp.sum(hl_ref[...], axis=1)                         # (TB, E)

    # [all body rows ; all headline rows] -> one reducer matmul for the step.
    pooled = jnp.concatenate([body_sum, hl_sum], axis=0)          # (2*TB, E)
    feats = jnp.dot(pooled, wred_ref[...],
                    preferred_element_type=jnp.float32) + ball_ref[0:1, :]
    feats = jnp.maximum(feats, 0.0)                               # (2*TB, 128)

    # ---- fc_body / fc_headline / concat / fc_output, folded host-side ----
    logits = (jnp.dot(feats[:tb, :], wout_ref[:128, :],
                      preferred_element_type=jnp.float32)
              + jnp.dot(feats[tb:, :], wout_ref[128:, :],
                        preferred_element_type=jnp.float32)
              + ball_ref[1:2, 0:4])                               # (TB, 4)

    # ---- numerically-stable log_softmax over the 4 classes ----
    m = jnp.max(logits, axis=-1, keepdims=True)
    shifted = logits - m
    lse = jnp.log(jnp.sum(jnp.exp(shifted), axis=-1, keepdims=True))
    out_ref[...] = shifted - lse


def pack_params(params, seq):
    """Host-side, one-time weight preprocessing (exact, no ReLU is crossed)."""
    wr, br = params["wr"], params["br"]          # (E,128), (1,128)
    wb, bb = params["wb"], params["bb"]          # (128,32), (1,32)
    wh, bh = params["wh"], params["bh"]          # (128,32), (1,32)
    wo, bo = params["wo"], params["bo"]          # (64,4),  (1,4)

    w_red = wr / float(seq)                      # fold token-mean divide
    w_out = jnp.concatenate([wb @ wo[:32, :], wh @ wo[32:, :]], axis=0)  # (256,4)
    b_out = bb @ wo[:32, :] + bh @ wo[32:, :] + bo                        # (1,4)

    b_all = jnp.zeros((2, 128), jnp.float32)
    b_all = b_all.at[0, :].set(br[0])
    b_all = b_all.at[1, :4].set(b_out[0])
    return {"w_red": w_red, "w_out": w_out, "b_all": b_all}


def stance_forward_batched(body, headline, packed, *, pairs_per_step=256):
    """body: (B, N, S, E), headline: (B, S, E) -> (B, 4) log-probs."""
    B, N, S, E = body.shape
    body_flat = body.reshape(B, N * S, E)        # free XLA reshape

    # One fat grid step per TB pairs.  pairs_per_step=256 keeps the per-step
    # footprint ~8 MiB (lane-padded) -> safe inside v7x's 32 MiB scoped VMEM.
    if B <= pairs_per_step:
        tb, b_pad = B, B                         # single step covers the batch
    else:
        tb = pairs_per_step                      # multiple of 8 (sublane align)
        b_pad = pl.cdiv(B, tb) * tb
        pad = b_pad - B
        if pad:
            body_flat = jnp.pad(body_flat, ((0, pad), (0, 0), (0, 0)))
            headline = jnp.pad(headline, ((0, pad), (0, 0), (0, 0)))
    num_blocks = b_pad // tb

    kernel = functools.partial(stance_kernel, n_sents=N)
    out = pl.pallas_call(
        kernel,
        out_shape=jax.ShapeDtypeStruct((b_pad, 4), jnp.float32),
        grid_spec=pltpu.PrefetchScalarGridSpec(
            num_scalar_prefetch=0,
            grid=(num_blocks,),
            in_specs=[
                pl.BlockSpec((tb, N * S, E), lambda b: (b, 0, 0)),  # body block
                pl.BlockSpec((tb, S, E), lambda b: (b, 0, 0)),      # headline blk
                pl.BlockSpec((E, 128), lambda b: (0, 0)),           # weights stay
                pl.BlockSpec((256, 4), lambda b: (0, 0)),           # resident
                pl.BlockSpec((2, 128), lambda b: (0, 0)),           # across grid
            ],
            out_specs=pl.BlockSpec((tb, 4), lambda b: (b, 0)),
        ),
        compiler_params=pltpu.CompilerParams(
            # Batch-block axis is independent -> shardable across the 2 v7x TCs;
            # measured no-op on v5e/v6e (single TC).
            dimension_semantics=("parallel",)),
    )(body_flat, headline, packed["w_red"], packed["w_out"], packed["b_all"])
    return out[:B]                               # drop any pad rows


def stance_forward(body, headline, packed):
    """Single-pair convenience wrapper matching the torch signature."""
    out = stance_forward_batched(body[None], headline[None], packed)
    return out[0]                                # (4,)


def reference_forward(body, headline, params):
    """Plain-JAX reference of the original (unpacked) module math."""
    def reducer(x):  # x: (B, S, E) -> (B, 128)
        return jnp.mean(x, axis=1) @ params["wr"] + params["br"][0]

    n = body.shape[0]
    body_feat = jnp.sum(reducer(body), axis=0) / n
    hl_feat = reducer(headline[None])[0]
    b32 = jnp.maximum(body_feat, 0.0) @ params["wb"] + params["bb"][0]
    h32 = jnp.maximum(hl_feat, 0.0) @ params["wh"] + params["bh"][0]
    cat = jnp.concatenate([b32, h32], axis=-1)
    logits = cat @ params["wo"] + params["bo"][0]
    return jax.nn.log_softmax(logits)


def init_params(key, emb=32):
    ks = jax.random.split(key, 8)
    scale = 0.05
    return {
        "wr": scale * jax.random.normal(ks[0], (emb, 128), jnp.float32),
        "br": scale * jax.random.normal(ks[1], (1, 128), jnp.float32),
        "wb": scale * jax.random.normal(ks[2], (128, 32), jnp.float32),
        "bb": scale * jax.random.normal(ks[3], (1, 32), jnp.float32),
        "wh": scale * jax.random.normal(ks[4], (128, 32), jnp.float32),
        "bh": scale * jax.random.normal(ks[5], (1, 32), jnp.float32),
        "wo": scale * jax.random.normal(ks[6], (64, 4), jnp.float32),
        "bo": scale * jax.random.normal(ks[7], (1, 4), jnp.float32),
    }


if __name__ == "__main__":
    key = jax.random.PRNGKey(0)
    kp, kb, kh = jax.random.split(key, 3)

    BATCH, N_SENTS, SEQ, EMB = 3, 4, 8, 32
    params = init_params(kp, emb=EMB)
    packed = pack_params(params, seq=SEQ)

    bodies = jax.random.normal(kb, (BATCH, N_SENTS, SEQ, EMB), jnp.float32)
    headlines = jax.random.normal(kh, (BATCH, SEQ, EMB), jnp.float32)

    # Batched kernel: one grid step covers all pairs at this batch size.
    out_b = jax.block_until_ready(stance_forward_batched(bodies, headlines, packed))
    assert out_b.shape == (BATCH, 4)

    # Per-pair reference check against the original (unpacked) module math.
    for i in range(BATCH):
        ref_i = reference_forward(bodies[i], headlines[i], params)
        assert jnp.allclose(out_b[i], ref_i, atol=1e-4, rtol=1e-4), (i, out_b[i], ref_i)

    # Single-pair wrapper (original torch signature shape).
    out_1 = jax.block_until_ready(stance_forward(bodies[0], headlines[0], packed))
    assert out_1.shape == (4,)
    assert jnp.allclose(out_1, reference_forward(bodies[0], headlines[0], params),
                        atol=1e-4, rtol=1e-4)

    print("KERNEL_OK")
</pallas_src>

<mosaic_0001>
module attributes {stable_mosaic.version = 11 : i64} {
  func.func @stance_kernel(%arg0: i32, %arg1: memref<3x32x32xf32, #tpu.memory_space<vmem>>, %arg2: memref<3x8x32xf32, #tpu.memory_space<vmem>>, %arg3: memref<32x128xf32, #tpu.memory_space<vmem>>, %arg4: memref<256x4xf32, #tpu.memory_space<vmem>>, %arg5: memref<2x128xf32, #tpu.memory_space<vmem>>, %arg6: memref<3x4xf32, #tpu.memory_space<vmem>>) attributes {dimension_semantics = [#tpu.dimension_semantics<parallel>], iteration_bounds = array<i64: 1>, scalar_prefetch = 0 : i64, scratch_operands = 0 : i64, tpu.core_type = #tpu.core_type<tc>, window_params = [{transform_indices = @transform_0, window_bounds = array<i64: 3, 32, 32>}, {transform_indices = @transform_1, window_bounds = array<i64: 3, 8, 32>}, {pipeline_mode = #tpu.pipeline_mode<synchronous>, transform_indices = @transform_2, window_bounds = array<i64: 32, 128>}, {pipeline_mode = #tpu.pipeline_mode<synchronous>, transform_indices = @transform_3, window_bounds = array<i64: 256, 4>}, {pipeline_mode = #tpu.pipeline_mode<synchronous>, transform_indices = @transform_4, window_bounds = array<i64: 2, 128>}, {transform_indices = @transform_5, window_bounds = array<i64: 3, 4>}]} {
    %c0 = arith.constant 0 : index
    %c0_0 = arith.constant 0 : index
    %c0_1 = arith.constant 0 : index
    %0 = vector.load %arg1[%c0, %c0_0, %c0_1] : memref<3x32x32xf32, #tpu.memory_space<vmem>>, vector<3x32x32xf32>
    %cst = arith.constant dense<0.000000e+00> : vector<3x32xf32>
    %1 = vector.multi_reduction <add>, %0, %cst [1] : vector<3x32x32xf32> to vector<3x32xf32>
    %cst_2 = arith.constant 2.500000e-01 : f32
    %2 = vector.broadcast %cst_2 : f32 to vector<3x32xf32>
    %3 = arith.mulf %1, %2 : vector<3x32xf32>
    %c0_3 = arith.constant 0 : index
    %c0_4 = arith.constant 0 : index
    %c0_5 = arith.constant 0 : index
    %4 = vector.load %arg2[%c0_3, %c0_4, %c0_5] : memref<3x8x32xf32, #tpu.memory_space<vmem>>, vector<3x8x32xf32>
    %cst_6 = arith.constant dense<0.000000e+00> : vector<3x32xf32>
    %5 = vector.multi_reduction <add>, %4, %cst_6 [1] : vector<3x8x32xf32> to vector<3x32xf32>
    %6 = tpu.concatenate %3, %5 in 0 : vector<3x32xf32>, vector<3x32xf32> -> vector<6x32xf32>
    %c0_7 = arith.constant 0 : index
    %c0_8 = arith.constant 0 : index
    %7 = vector.load %arg3[%c0_7, %c0_8] : memref<32x128xf32, #tpu.memory_space<vmem>>, vector<32x128xf32>
    %cst_9 = arith.constant dense<0.000000e+00> : vector<6x128xf32>
    %8 = tpu.matmul %6, %7, %cst_9 {dimension_numbers = #tpu.dot_dimension_numbers<[1], [0], [0], [1], [0, 0, 1, 1], [], []>} : vector<6x32xf32>, vector<32x128xf32>, vector<6x128xf32> -> vector<6x128xf32>
    %c0_10 = arith.constant 0 : index
    %c0_11 = arith.constant 0 : index
    %9 = vector.load %arg5[%c0_10, %c0_11] : memref<2x128xf32, #tpu.memory_space<vmem>>, vector<1x128xf32>
    %10 = vector.broadcast %9 : vector<1x128xf32> to vector<6x128xf32>
    %11 = arith.addf %8, %10 : vector<6x128xf32>
    %cst_12 = arith.constant 0.000000e+00 : f32
    %12 = vector.broadcast %cst_12 : f32 to vector<6x128xf32>
    %13 = arith.maximumf %11, %12 : vector<6x128xf32>
    %14 = vector.extract_strided_slice %13 {offsets = [0, 0], sizes = [3, 128], strides = [1, 1]} : vector<6x128xf32> to vector<3x128xf32>
    %c0_13 = arith.constant 0 : index
    %c0_14 = arith.constant 0 : index
    %15 = vector.load %arg4[%c0_13, %c0_14] : memref<256x4xf32, #tpu.memory_space<vmem>>, vector<128x4xf32>
    %cst_15 = arith.constant dense<0.000000e+00> : vector<3x4xf32>
    %16 = tpu.matmul %14, %15, %cst_15 {dimension_numbers = #tpu.dot_dimension_numbers<[1], [0], [0], [1], [0, 0, 1, 1], [], []>} : vector<3x128xf32>, vector<128x4xf32>, vector<3x4xf32> -> vector<3x4xf32>
    %17 = vector.extract_strided_slice %13 {offsets = [3, 0], sizes = [3, 128], strides = [1, 1]} : vector<6x128xf32> to vector<3x128xf32>
    %c128 = arith.constant 128 : index
    %c0_16 = arith.constant 0 : index
    %18 = vector.load %arg4[%c128, %c0_16] : memref<256x4xf32, #tpu.memory_space<vmem>>, vector<128x4xf32>
    %cst_17 = arith.constant dense<0.000000e+00> : vector<3x4xf32>
    %19 = tpu.matmul %17, %18, %cst_17 {dimension_numbers = #tpu.dot_dimension_numbers<[1], [0], [0], [1], [0, 0, 1, 1], [], []>} : vector<3x128xf32>, vector<128x4xf32>, vector<3x4xf32> -> vector<3x4xf32>
    %20 = arith.addf %16, %19 : vector<3x4xf32>
    %c1 = arith.constant 1 : index
    %c0_18 = arith.constant 0 : index
    %21 = vector.load %arg5[%c1, %c0_18] : memref<2x128xf32, #tpu.memory_space<vmem>>, vector<1x4xf32>
    %22 = vector.broadcast %21 : vector<1x4xf32> to vector<3x4xf32>
    %23 = arith.addf %20, %22 : vector<3x4xf32>
    %cst_19 = arith.constant dense<0xFF800000> : vector<3xf32>
    %24 = vector.multi_reduction <maximumf>, %23, %cst_19 [1] : vector<3x4xf32> to vector<3xf32>
    %25 = vector.shape_cast %24 : vector<3xf32> to vector<3x1xf32>
    %26 = vector.broadcast %25 : vector<3x1xf32> to vector<3x4xf32>
    %27 = arith.subf %23, %26 : vector<3x4xf32>
    %28 = math.exp %27 : vector<3x4xf32>
    %cst_20 = arith.constant dense<0.000000e+00> : vector<3xf32>
    %29 = vector.multi_reduction <add>, %28, %cst_20 [1] : vector<3x4xf32> to vector<3xf32>
    %30 = vector.shape_cast %29 : vector<3xf32> to vector<3x1xf32>
    %31 = math.log %30 : vector<3x1xf32>
    %32 = vector.broadcast %31 : vector<3x1xf32> to vector<3x4xf32>
    %33 = arith.subf %27, %32 : vector<3x4xf32>
    %c0_21 = arith.constant 0 : index
    %c0_22 = arith.constant 0 : index
    %34 = vector.load %arg6[%c0_21, %c0_22] : memref<3x4xf32, #tpu.memory_space<vmem>>, vector<3x4xf32>
    tpu.vector_store %arg6[%c0_21, %c0_22], %33 {strides = array<i32>} : memref<3x4xf32, #tpu.memory_space<vmem>>, vector<3x4xf32>,
    return
  }
  func.func @transform_0(%arg0: i32) -> (i32, i32, i32) {
    %c0_i32 = arith.constant 0 : i32
    %c0_i32_0 = arith.constant 0 : i32
    %c0_i32_1 = arith.constant 0 : i32
    return %arg0, %c0_i32, %c0_i32_0 : i32, i32, i32
  }
  func.func @transform_1(%arg0: i32) -> (i32, i32, i32) {
    %c0_i32 = arith.constant 0 : i32
    %c0_i32_0 = arith.constant 0 : i32
    %c0_i32_1 = arith.constant 0 : i32
    return %arg0, %c0_i32, %c0_i32_0 : i32, i32, i32
  }
  func.func @transform_2(%arg0: i32) -> (i32, i32) {
    %c0_i32 = arith.constant 0 : i32
    %c0_i32_0 = arith.constant 0 : i32
    %c0_i32_1 = arith.constant 0 : i32
    return %c0_i32, %c0_i32_0 : i32, i32
  }
  func.func @transform_3(%arg0: i32) -> (i32, i32) {
    %c0_i32 = arith.constant 0 : i32
    %c0_i32_0 = arith.constant 0 : i32
    %c0_i32_1 = arith.constant 0 : i32
    return %c0_i32, %c0_i32_0 : i32, i32
  }
  func.func @transform_4(%arg0: i32) -> (i32, i32) {
    %c0_i32 = arith.constant 0 : i32
    %c0_i32_0 = arith.constant 0 : i32
    %c0_i32_1 = arith.constant 0 : i32
    return %c0_i32, %c0_i32_0 : i32, i32
  }
  func.func @transform_5(%arg0: i32) -> (i32, i32) {
    %c0_i32 = arith.constant 0 : i32
    %c0_i32_0 = arith.constant 0 : i32
    return %arg0, %c0_i32 : i32, i32
  }
}

</mosaic_0001>

<bundles_post_ra>
// kernel: tpu_custom_call.1
= control target key start
LH: loop header
LB: loop body
LE: loop exit
PB: predicated region body
PF: predicated region fallthrough
CT: control target
= control target key end

     0   :  { %v619_v3 = vmov 0.0|0.0   ;;  %vm620_vm0 = vmmov 0   ;;  %v621_v6 = vmov 0.0   ;;  %vm33_vm1 = vcmask 261120   ;;  %s867_s0 = inlined_call_operand.vmem [shape: f32[3,32,32], index: 0, kind: input, shape index: {}]   ;;  %s868_s1 = inlined_call_operand.vmem [shape: f32[3,8,32], index: 1, kind: input, shape index: {}]   ;;  %s869_s2 = inlined_call_operand.vmem [shape: f32[32,128], index: 2, kind: input, shape index: {}]   ;;  %s870_s3 = inlined_call_operand.vmem [shape: f32[256,4], index: 3, kind: input, shape index: {}]   ;;  %s871_s4 = inlined_call_operand.vmem [shape: f32[2,128], index: 4, kind: input, shape index: {}]   ;;  %s872_s5 = inlined_call_operand.hbm [shape: f32[3,4], index: 5, kind: output, shape index: {}]  }
   0x1   :  { %v118_v0 = vld [vmem:[%s869_s2] sm:$0xff]  ;;  %v119_v1 = vld [vmem:[%s869_s2 + $0x8] sm:$0xff]  ;;  %v120_v2 = vld [vmem:[%s869_s2 + $0x10] sm:$0xff]  ;;  %533 = vmatprep.subr.bf16.mxu0 %v619_v3  ;;  %460 = vmatprep.mubr.msk.f32.mxu0 %vm620_vm0, %v621_v6 }
   0x2   :  { %v534_v4 = vpack.c.bf16 %v119_v1, %v118_v0  ;;  %v121_v5 = vld [vmem:[%s869_s2 + $0x18] sm:$0xff]  ;;  %v21_v7 = vld [vmem:[%s867_s0] sm:$0xff]  ;;  %v22_v8 = vld [vmem:[%s867_s0 + $0x8] sm:$0xff]  ;;  %539 = vmatprep.subr.bf16.mxu1 %v619_v3  ;;  %495 = vmatprep.mubr.msk.f32.mxu1 %vm620_vm0, %v621_v6 }
   0x3   :  { %v537_v9 = vpack.c.bf16 %v121_v5, %v120_v2  ;;  %v23_v10 = vld [vmem:[%s867_s0 + $0x10] sm:$0xff]  ;;  %v24_v11 = vld [vmem:[%s867_s0 + $0x18] sm:$0xff]  ;;  %v25_v12 = vld [vmem:[%s867_s0 + $0x20] sm:$0xff]  ;;  %v34_v13 = vsel %vm33_vm1, %v21_v7, 0.0  ;;  %v35_v14 = vsel %vm33_vm1, %v22_v8, 0.0 }
   0x4   :  { %535 = vmatpush3.bf16.msra.mxu0 %v534_v4  ;;  %v26_v15 = vld [vmem:[%s867_s0 + $0x28] sm:$0xff]  ;;  %v27_v16 = vld [vmem:[%s867_s0 + $0x30] sm:$0xff]  ;;  %v28_v17 = vld [vmem:[%s867_s0 + $0x38] sm:$0xff]  ;;  %v36_v18 = vadd.f32 %v35_v14, %v34_v13  ;;  %v37_v19 = vsel %vm33_vm1, %v23_v10, 0.0  ;;  %v39_v20 = vsel %vm33_vm1, %v24_v11, 0.0  ;;  %v47_v21 = vsel %vm33_vm1, %v25_v12, 0.0 }
   0x5   :  { %536 = vmatprep.subr.bf16.mxu0 %v619_v3  ;;  %v29_v22 = vld [vmem:[%s867_s0 + $0x40] sm:$0xff]  ;;  %v30_v23 = vld [vmem:[%s867_s0 + $0x48] sm:$0xff]  ;;  %v31_v24 = vld [vmem:[%s867_s0 + $0x50] sm:$0xff]  ;;  %v48_v25 = vsel %vm33_vm1, %v26_v15, 0.0  ;;  %v50_v26 = vsel %vm33_vm1, %v27_v16, 0.0  ;;  %v52_v27 = vsel %vm33_vm1, %v28_v17, 0.0 }
   0x6   :  { %v32_v28 = vld [vmem:[%s867_s0 + $0x58] sm:$0xff]  ;;  %v38_v29 = vadd.f32 %v37_v19, %v36_v18  ;;  %v49_v30 = vadd.f32 %v48_v25, %v47_v21  ;;  %v60_v31 = vsel %vm33_vm1, %v29_v22, 0.0  ;;  %v61_v32 = vsel %vm33_vm1, %v30_v23, 0.0  ;;  %v76_v33 = vld [vmem:[%s868_s1] sm:$0xff]  ;;  %v77_v34 = vld [vmem:[%s868_s1 + $0x8] sm:$0xff] }
   0x7   :  { %v62_v35 = vadd.f32 %v61_v32, %v60_v31  ;;  %v63_v36 = vsel %vm33_vm1, %v31_v24, 0.0  ;;  %v65_v37 = vsel %vm33_vm1, %v32_v28, 0.0  ;;  %v78_v38 = vld [vmem:[%s868_s1 + $0x10] sm:$0xff]  ;;  %v79_v39 = vsel %vm33_vm1, %v76_v33, 0.0  ;;  %v217_v51 = vld [vmem:[%s870_s3 + $0x80] sm:$0xff]  ;;  %v218_v52 = vld [vmem:[%s870_s3 + $0x88] sm:$0xff] }
   0x8   :  { %538 = vmatpush3.bf16.msra.mxu0 %v537_v9  ;;  %v40_v40 = vadd.f32 %v39_v20, %v38_v29  ;;  %v51_v41 = vadd.f32 %v50_v26, %v49_v30  ;;  %v80_v42 = vrot.slane %v79_v39, 4  ;;  %v86_v43 = vsel %vm33_vm1, %v77_v34, 0.0  ;;  %v219_v59 = vld [vmem:[%s870_s3 + $0x90] sm:$0xff]  ;;  %v220_v60 = vld [vmem:[%s870_s3 + $0x98] sm:$0xff]  ;;  %v221_v13 = vld [vmem:[%s870_s3 + $0xa0] sm:$0xff] }
   0x9   :  { %v64_v44 = vadd.f32 %v63_v36, %v62_v35  ;;  %v87_v45 = vrot.slane %v86_v43, 4  ;;  %v93_v46 = vsel %vm33_vm1, %v78_v38, 0.0  ;;  %563 = vmatprep.subr.bf16.mxu0 %v619_v3  ;;  %v540_v63 = vpack.c.bf16 %v218_v52, %v217_v51  ;;  %v222_v14 = vld [vmem:[%s870_s3 + $0xa8] sm:$0xff] }
   0xa   :  { %v41_v47 = vrot.slane %v40_v40, 4  ;;  %v53_v48 = vadd.f32 %v52_v27, %v51_v41  ;;  %v81_v49 = vadd.f32 %v80_v42, %v79_v39  ;;  %v94_v50 = vrot.slane %v93_v46, 4 }
   0xb   :  { %v66_v53 = vadd.f32 %v65_v37, %v64_v44  ;;  %v88_v54 = vadd.f32 %v87_v45, %v86_v43  ;;  %541 = vmatpush3.bf16.msra.mxu1 %v540_v63  ;;  %v543_v8 = vpack.c.bf16 %v220_v60, %v219_v59 }
   0xc   :  { %v42_v55 = vadd.f32 %v41_v47, %v40_v40  ;;  %v54_v56 = vrot.slane %v53_v48, 4  ;;  %v82_v57 = vrot.slane %v81_v49, 2  ;;  %v95_v58 = vadd.f32 %v94_v50, %v93_v46  ;;  %542 = vmatprep.subr.bf16.mxu1 %v619_v3 }
   0xd   :  { %v67_v61 = vrot.slane %v66_v53, 4  ;;  %v89_v62 = vrot.slane %v88_v54, 2 }
   0xe   :  { %v43_v0 = vrot.slane %v42_v55, 2  ;;  %v55_v1 = vadd.f32 %v54_v56, %v53_v48  ;;  %v83_v2 = vadd.f32 %v82_v57, %v81_v49  ;;  %v96_v4 = vrot.slane %v95_v58, 2 }
   0xf   :  { %v68_v5 = vadd.f32 %v67_v61, %v66_v53  ;;  %v90_v7 = vadd.f32 %v89_v62, %v88_v54 }
  0x10   :  { %v44_v9 = vadd.f32 %v43_v0, %v42_v55  ;;  %v56_v10 = vrot.slane %v55_v1, 2  ;;  %v84_v11 = vrot.slane %v83_v2, 1  ;;  %v97_v12 = vadd.f32 %v96_v4, %v95_v58 }
  0x11   :  { %10 = vsyncpa [#allocation3], 0  ;;  %v69_v15 = vrot.slane %v68_v5, 2  ;;  %v91_v16 = vrot.slane %v90_v7, 1  ;;  %vm111_vm2 = vcmask 1044484   ;;  %544 = vmatpush3.bf16.msra.mxu1 %v543_v8  ;;  %v546_v23 = vpack.c.bf16 %v222_v14, %v221_v13  ;;  %v223_v26 = vld [vmem:[%s870_s3 + $0xb0] sm:$0xff] }
  0x12   :  { %v45_v17 = vrot.slane %v44_v9, 1  ;;  %v57_v18 = vadd.f32 %v56_v10, %v55_v1  ;;  %v85_v19 = vadd.f32 %v84_v11, %v83_v2  ;;  %v98_v20 = vrot.slane %v97_v12, 1  ;;  %545 = vmatprep.subr.bf16.mxu1 %v619_v3  ;;  %v224_v27 = vld [vmem:[%s870_s3 + $0xb8] sm:$0xff]  ;;  %v201_v34 = vld [vmem:[%s870_s3] sm:$0xff]  ;;  %v202_v35 = vld [vmem:[%s870_s3 + $0x8] sm:$0xff] }
  0x13   :  { %v70_v21 = vadd.f32 %v69_v15, %v68_v5  ;;  %v92_v22 = vadd.f32 %v91_v16, %v90_v7  ;;  %vm113_vm3 = vcmask 1045509   ;;  %vm103_vm4 = vcmask 1041409   ;;  %v225_v38 = vld [vmem:[%s870_s3 + $0xc0] sm:$0xff]  ;;  %v226_v39 = vld [vmem:[%s870_s3 + $0xc8] sm:$0xff]  ;;  %v203_v45 = vld [vmem:[%s870_s3 + $0x10] sm:$0xff] }
  0x14   :  { %v46_v24 = vadd.f32 %v45_v17, %v44_v9  ;;  %v58_v25 = vrot.slane %v57_v18, 1  ;;  %v99_v29 = vadd.f32 %v98_v20, %v97_v12  ;;  %v549_v36 = vpack.c.bf16 %v224_v27, %v223_v26  ;;  %v204_v46 = vld [vmem:[%s870_s3 + $0x18] sm:$0xff]  ;;  %v227_v49 = vld [vmem:[%s870_s3 + $0xd0] sm:$0xff]  ;;  %v205_v52 = vld [vmem:[%s870_s3 + $0x20] sm:$0xff] }
  0x15   :  { %v71_v28 = vrot.slane %v70_v21, 1  ;;  %v112_v32 = vsel %vm111_vm2, %v92_v22, %v85_v19  ;;  %547 = vmatpush3.bf16.msra.mxu1 %v546_v23  ;;  %vm105_vm5 = vcmask 1042434   ;;  %vm116_vm6 = vcmask 1042432   ;;  %v228_v50 = vld [vmem:[%s870_s3 + $0xd8] sm:$0xff]  ;;  %v206_v53 = vld [vmem:[%s870_s3 + $0x28] sm:$0xff]  ;;  %v209_v58 = vld [vmem:[%s870_s3 + $0x40] sm:$0xff] }
  0x16   :  { %v59_v30 = vadd.f32 %v58_v25, %v57_v18  ;;  %v73_v31 = vmul.f32 0.25, %v46_v24  ;;  %548 = vmatprep.subr.bf16.mxu1 %v619_v3  ;;  %v114_v41 = vsel %vm113_vm3, %v99_v29, %v112_v32  ;;  %v564_v43 = vpack.c.bf16 %v202_v35, %v201_v34  ;;  %v208_v56 = vld [vmem:[%s870_s3 + $0x38] sm:$0xff]  ;;  %v210_v59 = vld [vmem:[%s870_s3 + $0x48] sm:$0xff]  ;;  %v211_v61 = vld [vmem:[%s870_s3 + $0x50] sm:$0xff] }
  0x17   :  { %v72_v33 = vadd.f32 %v71_v28, %v70_v21  ;;  %v552_v47 = vpack.c.bf16 %v226_v39, %v225_v38  ;;  %v567_v51 = vpack.c.bf16 %v204_v46, %v203_v45  ;;  %v555_v54 = vpack.c.bf16 %v228_v50, %v227_v49  ;;  %v212_v62 = vld [vmem:[%s870_s3 + $0x58] sm:$0xff]  ;;  %v213_v0 = vld [vmem:[%s870_s3 + $0x60] sm:$0xff]  ;;  %v214_v1 = vld [vmem:[%s870_s3 + $0x68] sm:$0xff] }
  0x18   :  { %v74_v37 = vmul.f32 0.25, %v59_v30  ;;  %v570_v55 = vpack.c.bf16 %v206_v53, %v205_v52  ;;  %v576_v60 = vpack.c.bf16 %v210_v59, %v209_v58  ;;  %v579_v63 = vpack.c.bf16 %v212_v62, %v211_v61  ;;  %v229_v4 = vld [vmem:[%s870_s3 + $0xe0] sm:$0xff]  ;;  %v230_v5 = vld [vmem:[%s870_s3 + $0xe8] sm:$0xff]  ;;  %v215_v8 = vld [vmem:[%s870_s3 + $0x70] sm:$0xff] }
  0x19   :  { %v75_v40 = vmul.f32 0.25, %v72_v33  ;;  %550 = vmatpush3.bf16.msra.mxu1 %v549_v36  ;;  %v582_v2 = vpack.c.bf16 %v214_v1, %v213_v0  ;;  %v558_v7 = vpack.c.bf16 %v230_v5, %v229_v4  ;;  %v216_v9 = vld [vmem:[%s870_s3 + $0x78] sm:$0xff]  ;;  %v231_v11 = vld [vmem:[%s870_s3 + $0xf0] sm:$0xff]  ;;  %v410_v14 = vld [vmem:[%s871_s4] ss:$0 sm:$0xff]  ;;  %vm382_vm7 = vcmask 26624  }
  0x1a   :  { %v104_v42 = vsel %vm103_vm4, %v74_v37, %v73_v31  ;;  %551 = vmatprep.subr.bf16.mxu1 %v619_v3  ;;  %v585_v10 = vpack.c.bf16 %v216_v9, %v215_v8  ;;  %v232_v12 = vld [vmem:[%s870_s3 + $0xf8] sm:$0xff]  ;;  %v412_v22 = vld [vmem:[%s871_s4 + $0x1] ss:$0 sm:$0xff] }
  0x1b   :  { %v106_v44 = vsel %vm105_vm5, %v75_v40, %v104_v42  ;;  %v561_v13 = vpack.c.bf16 %v232_v12, %v231_v11 }
  0x1c   :  { %v117_v48 = vsel %vm116_vm6, %v106_v44, %v114_v41 }
  0x1d   :  { %461 = vmatmul.mubr.msk.f32.vlgmr.msra.gmra.mrb[0].mxu0 %vm33_vm1, %v117_v48  ;;  %553 = vmatpush3.bf16.msra.mxu1 %v552_v47 }
  0x1e   :  { %565 = vmatpush3.bf16.msra.mxu0 %v564_v43  ;;  %530 = vmatprep.mubr.msk.f32.mxu0 %vm620_vm0, %v621_v6  ;;  %v207_v6 = vld [vmem:[%s870_s3 + $0x30] sm:$0xff]  ;;  %s622_s3 = smov [#allocation2]  }
  0x1f   :  { %566 = vmatprep.subr.bf16.mxu0 %v619_v3  ;;  %554 = vmatprep.subr.bf16.mxu1 %v619_v3  ;;  %v573_v57 = vpack.c.bf16 %v208_v56, %v207_v6  ;;  %s402_s4 = sshll.u32 %s622_s3, 4  ;;  %s403_s4 = int_to_ptr.vmem [resolvable:$true] %s402_s4 }
  0x20   :  { %s595_s14 = scalar_lea.vmem %s403_s4, 64  ;;  %p600_p1 = scmp.lt.s32.totalorder %s403_s4, %s403_s4 }
  0x21   :  { %556 = vmatpush3.bf16.msra.mxu1 %v555_v54  ;;  %p596_p0 = scmp.ne.s32.totalorder %s403_s4, %s595_s14  ;;  %p601_p2 = scmp.lt.s32.totalorder %s595_s14, %s595_s14 }
  0x22   :  { %568 = vmatpush3.bf16.msra.mxu0 %v567_v51  ;;  %557 = vmatprep.subr.bf16.mxu1 %v619_v3 }
  0x23   :  { %569 = vmatprep.subr.bf16.mxu0 %v619_v3  ;;  %p602_p3 = por %p601_p2, %p600_p1 }
  0x25   :  { %559 = vmatpush3.bf16.msra.mxu1 %v558_v7  ;;  %p603_p4 = pnand %p602_p3, %p596_p0 }
  0x26   :  { %571 = vmatpush3.bf16.msra.mxu0 %v570_v55  ;;  %560 = vmatprep.subr.bf16.mxu1 %v619_v3 }
  0x27   :  { %572 = vmatprep.subr.bf16.mxu0 %v619_v3 }
  0x29   :  { %562 = vmatpush3.bf16.msra.mxu1 %v561_v13 }
  0x2a   :  { %574 = vmatpush3.bf16.msra.mxu0 %v573_v57 }
  0x2b   :  { %575 = vmatprep.subr.bf16.mxu0 %v619_v3 }
  0x2e   :  { %577 = vmatpush3.bf16.msra.mxu0 %v576_v60 }
  0x2f   :  { %578 = vmatprep.subr.bf16.mxu0 %v619_v3 }
  0x32   :  { %580 = vmatpush3.bf16.msra.mxu0 %v579_v63 }
  0x33   :  { %581 = vmatprep.subr.bf16.mxu0 %v619_v3 }
  0x36   :  { %583 = vmatpush3.bf16.msra.mxu0 %v582_v2 }
  0x37   :  { %584 = vmatprep.subr.bf16.mxu0 %v619_v3 }
  0x3a   :  { %586 = vmatpush3.bf16.msra.mxu0 %v585_v10 }
  0xf0   :  { %v196_v15 = vpop.f32.mrb[0].mxu0 }
  0xf1   :  { %v197_v16 = vadd.f32 %v410_v14, %v196_v15  ;;  %v462_v17 = vpop.f32.mrb[1].mxu0 }
  0xf3   :  { %v200_v18 = vmax.f32 %v197_v16, 0.0 }
  0xf5   :  { %v234_v3 = vrot.slane %v200_v18, 3  ;;  %531 = vmatmul.mubr.f32.vlgmr.msra.gmra.mrb[2].mxu0 %v200_v18 }
  0xf7   :  { %496 = vmatmul.mubr.f32.vlgmr.msra.gmra.mrb[0].mxu1 %v234_v3 }
 0x1c8   :  { %v372_v19 = vpop.f32.mrb[2].mxu0 }
 0x1c9   :  { %v532_v20 = vpop.f32.mrb[3].mxu0 }
 0x1ca   :  { %v302_v21 = vpop.f32.mrb[0].mxu1 }
 0x1cb   :  { %v373_v23 = vadd.f32 %v372_v19, %v302_v21  ;;  %v497_v24 = vpop.f32.mrb[1].mxu1 }
 0x1cd   :  { %v381_v25 = vadd.f32 %v412_v22, %v373_v23 }
 0x1cf   :  { %v383_v26 = vsel %vm382_vm7, %v381_v25, -inf }
 0x1d0   :  { %384 = vmax.xlane.f32.xlu0 %v383_v26 }
 0x25d   :  { %v385_v27 = vpop.xlane.xlu0 %384 }
 0x25e   :  { %v386_v28 = vsub.f32 %v381_v25, %v385_v27 }
 0x260   :  { %v387_v29 = vmul.f32 1.442695, %v386_v28 }
 0x262   :  { %591 = vpow2.f32 %v387_v29 }
 0x26c   :  { %v592_v30 = vpop.eup %591 }
 0x26d   :  { %v389_v31 = vsel %vm382_vm7, %v592_v30, 0.0 }
 0x26e   :  { %390 = vadd.xlane.f32.xlu0 %v389_v31 }
 0x2fb   :  { %v391_v32 = vpop.xlane.xlu0 %390 }
 0x2fc   :  { %593 = vlog2.f32 %v391_v32 }
 0x306   :  { %v594_v33 = vpop.eup %593 }
 0x307   :  { %v393_v34 = vmul.f32 0.6931472, %v594_v33 }
 0x309   :  { %v394_v35 = vsub.f32 %v386_v28, %v393_v34 }
 0x30b   :  { %395 = vst.msk [vmem:[#allocation2] sm:$0x7] %vm382_vm7, %v394_v35 }
 0x30c   :  { %606 = shalt.err (!%p603_p4)
}
 0x30d   :  { %s607_s17 = scalar_lea.hbm %s872_s5, 64 }
 0x30e   :  { %p608_p5 = scmp.ne.s32.totalorder %s872_s5, %s607_s17  ;;  %p611_p6 = scmp.lt.u32.totalorder %s607_s17, %s872_s5 }
 0x310   :  { %p613_p7 = pnand %p611_p6, %p608_p5 }
 0x312   :  { %616 = shalt.err (!%p613_p7)
}
 0x313   :  { %405 = dma.vmem_to_hbm [thread:$0]  %s403_s4, 64, %s872_s5, [#allocation3]  }
 0x314   :  { %617 = dma.done.wait [#allocation3], 64  }
 0x315   :  { %618 = vsyncadd [#allocation3], 4294967232 }
 0x316   :  { %409 = vsyncpa [#allocation3], 1 }

</bundles_post_ra>
